<compile_context>
chip_gen: v6e
topology: v6e:2x2x1
jax: 0.10.0
libtpu: 0.0.40
codegen_flags: <defaults>
</compile_context>

<pallas_src>
import jax
import jax.numpy as jnp
from jax import lax
from jax.experimental import pallas as pl
from jax.experimental.pallas import tpu as pltpu

_SUBLANE = 8
_LANE = 128


def _round_up(n, m):
    return pl.cdiv(n, m) * m


def _tensorcores_per_chip():
    """2 on v7x (megacore sharding of a 'parallel' grid axis), else 1."""
    try:
        kind = (jax.devices()[0].device_kind or "").lower()
    except Exception:
        return 1
    return 2 if ("v7" in kind or "tpu7" in kind) else 1


def _choose_tiling(B, max_tm, n_cores):
    """Pick (TM, steps) so the grid has the minimum / core-balanced #steps."""
    min_steps = max(1, pl.cdiv(B, max_tm))
    steps = min_steps
    # On multi-TC chips, use an even split so both cores get equal work
    # (but don't bother splitting tiny act()-style batches).
    if n_cores > 1 and B >= 2 * _SUBLANE:
        steps = _round_up(max(steps, n_cores), n_cores)
    TM = _round_up(pl.cdiv(B, steps), _SUBLANE)
    return TM, steps


def _make_mlp_kernel(num_layers, action_dim, with_q):
    """Fused MLP kernel: L Linear layers (+ReLU between) + greedy argmax."""

    def kernel(*refs):
        # refs = x, (w1, b1), ..., (wL, bL), [q_out], act_out
        x_ref = refs[0]
        out0 = 1 + 2 * num_layers
        if with_q:
            q_ref, act_ref = refs[out0], refs[out0 + 1]
        else:
            act_ref = refs[out0]

        h = x_ref[...]
        for l in range(num_layers):
            w = refs[1 + 2 * l][...]
            b = refs[2 + 2 * l][...]
            h = jnp.dot(h, w, preferred_element_type=jnp.float32) + b
            if l < num_layers - 1:
                h = jnp.maximum(h, 0.0)

        # h: (TM, OUT_PAD) f32, full-lane.  Padded columns are exact zeros
        # (zero-padded weights/biases) but are masked to -inf anyway so the
        # fused argmax only sees real actions.  Ties resolve to the lowest
        # index, matching torch.argmax / jnp.argmax.
        col = lax.broadcasted_iota(jnp.int32, h.shape, 1)
        valid = col < action_dim
        qm = jnp.where(valid, h, -jnp.inf)
        qmax = jnp.max(qm, axis=-1, keepdims=True)
        hit = jnp.where(jnp.logical_and(valid, qm == qmax), col, h.shape[-1])
        act_ref[...] = jnp.min(hit, axis=-1, keepdims=True).astype(jnp.int32)

        if with_q:
            # Narrow (TM, action_dim) store: 32x less HBM writeback than a
            # 128-lane padded slab; masked vst cost is negligible here.
            q_ref[...] = h[:, :action_dim].astype(q_ref.dtype)

    return kernel


def policy_network_forward(state, params, *, tm=4096, with_q=True):
    """Fused MLP forward + greedy-action selection.

    state:  (B, state_dim) float32
    params: dict with w1..wL stored as (in, out) [transposed vs torch] and
            b1..bL stored as (1, out).
    Returns (q_values: (B, action_dim) f32, actions: (B,) int32) if with_q,
    otherwise just actions: (B,) int32 (inference/act() path).
    """
    B, state_dim = state.shape
    num_layers = len(params) // 2
    action_dim = params[f"w{num_layers}"].shape[1]

    n_cores = _tensorcores_per_chip()
    TM, steps = _choose_tiling(B, tm, n_cores)
    B_pad = TM * steps
    x = state if B_pad == B else jnp.pad(state, ((0, B_pad - B), (0, 0)))

    const00 = lambda i: (0, 0)   # weights/biases: same block every step -> VMEM-resident
    batch_row = lambda i: (i, 0)

    # Zero-pad hidden widths (and the final output width) to multiples of 128
    # so every intermediate is a full-lane tensor.  state_dim is NOT padded.
    flat_params = []
    in_specs = [pl.BlockSpec((TM, state_dim), batch_row)]
    for l in range(1, num_layers + 1):
        w = params[f"w{l}"]
        b = params[f"b{l}"]
        in_d, out_d = w.shape
        in_p = in_d if l == 1 else _round_up(in_d, _LANE)
        out_p = _round_up(out_d, _LANE)
        wp = jnp.pad(w, ((0, in_p - in_d), (0, out_p - out_d)))
        bp = jnp.pad(b, ((0, 0), (0, out_p - out_d)))
        flat_params += [wp, bp]
        in_specs += [pl.BlockSpec(wp.shape, const00),
                     pl.BlockSpec(bp.shape, const00)]

    # Advisory cost estimate: this kernel is tiny; let XLA overlap neighbors.
    flops = 0
    bytes_accessed = x.size * x.dtype.itemsize
    for arr in flat_params:
        bytes_accessed += arr.size * arr.dtype.itemsize
    for l in range(num_layers):
        w = flat_params[2 * l]
        flops += 2 * B_pad * w.shape[0] * w.shape[1]
    bytes_accessed += B_pad * 4                      # int32 actions
    if with_q:
        bytes_accessed += B_pad * action_dim * 4     # f32 Q-values

    kernel = _make_mlp_kernel(num_layers, action_dim, with_q)

    if with_q:
        out_shape = (
            jax.ShapeDtypeStruct((B_pad, action_dim), jnp.float32),
            jax.ShapeDtypeStruct((B_pad, 1), jnp.int32),
        )
        out_specs = [
            pl.BlockSpec((TM, action_dim), batch_row),
            pl.BlockSpec((TM, 1), batch_row),
        ]
    else:
        out_shape = jax.ShapeDtypeStruct((B_pad, 1), jnp.int32)
        out_specs = pl.BlockSpec((TM, 1), batch_row)

    result = pl.pallas_call(
        kernel,
        out_shape=out_shape,
        grid_spec=pltpu.PrefetchScalarGridSpec(
            num_scalar_prefetch=0,
            grid=(steps,),
            in_specs=in_specs,
            out_specs=out_specs,
        ),
        compiler_params=pltpu.CompilerParams(
            dimension_semantics=("parallel",)),
        cost_estimate=pl.CostEstimate(
            flops=flops, transcendentals=0, bytes_accessed=bytes_accessed),
    )(x, *flat_params)

    if with_q:
        q_pad, act_pad = result
        return q_pad[:B], act_pad[:B, 0]
    return result[:B, 0]


def init_params(key, state_dim, hidden_layers, action_dim):
    """nn.Linear-style init (U[-1/sqrt(fan_in), 1/sqrt(fan_in)]).

    Weights stored transposed vs PyTorch, i.e. (in, out); biases as (1, out).
    """
    dims = [state_dim] + list(hidden_layers) + [action_dim]
    params = {}
    for i in range(len(dims) - 1):
        fan_in, fan_out = dims[i], dims[i + 1]
        key, kw, kb = jax.random.split(key, 3)
        bound = 1.0 / jnp.sqrt(jnp.float32(fan_in))
        params[f"w{i+1}"] = jax.random.uniform(
            kw, (fan_in, fan_out), jnp.float32, minval=-bound, maxval=bound)
        params[f"b{i+1}"] = jax.random.uniform(
            kb, (1, fan_out), jnp.float32, minval=-bound, maxval=bound)
    return params


def reference_forward(state, params):
    """Pure-JAX reference of the same MLP."""
    num_layers = len(params) // 2
    h = state
    for l in range(1, num_layers + 1):
        h = h @ params[f"w{l}"] + params[f"b{l}"]
        if l < num_layers:
            h = jnp.maximum(h, 0.0)
    return h


if __name__ == "__main__":
    # Module-consistent shapes: settings.state_dim=8, settings.hidden_layers=[32, 32],
    # settings.action_dim=4.
    STATE_DIM = 8
    HIDDEN = [32, 32]
    ACTION_DIM = 4

    key = jax.random.PRNGKey(0)
    key, k_small, k_big = jax.random.split(key, 3)
    params = init_params(key, STATE_DIM, HIDDEN, ACTION_DIM)

    # 1) Tiny act()-style batch (B=2): single padded grid step.
    state_small = jax.random.normal(k_small, (2, STATE_DIM), dtype=jnp.float32)
    q_small, a_small = policy_network_forward(state_small, params)
    q_small = jax.block_until_ready(q_small)
    ref_small = reference_forward(state_small, params)
    assert q_small.shape == (2, ACTION_DIM)
    assert a_small.shape == (2,)
    assert jnp.allclose(q_small, ref_small, atol=1e-5, rtol=1e-5), "Q mismatch (B=2)"
    assert jnp.array_equal(a_small, jnp.argmax(ref_small, axis=-1)), "argmax mismatch (B=2)"

    # 1b) Actions-only inference path (no Q writeback at all).
    a_only = policy_network_forward(state_small, params, with_q=False)
    a_only = jax.block_until_ready(a_only)
    assert jnp.array_equal(a_only, jnp.argmax(ref_small, axis=-1)), "act-only mismatch (B=2)"

    # 2) Replay-buffer-style batch: grid=(1,) on single-TC chips, even (2,) on v7x.
    B_BIG = 1200
    state_big = jax.random.normal(k_big, (B_BIG, STATE_DIM), dtype=jnp.float32)
    q_big, a_big = policy_network_forward(state_big, params)
    q_big = jax.block_until_ready(q_big)
    ref_big = reference_forward(state_big, params)
    assert q_big.shape == (B_BIG, ACTION_DIM)
    assert jnp.allclose(q_big, ref_big, atol=1e-4, rtol=1e-5), "Q mismatch (B=1200)"
    assert jnp.array_equal(a_big, jnp.argmax(ref_big, axis=-1)), "argmax mismatch (B=1200)"

    # TODO(synk): train()/get_action() epsilon-greedy RNG, optimizer step and
    # checkpoint I/O are host-side logic outside the forward pass; not kernelized.
    print("KERNEL_OK")
</pallas_src>

<mosaic_0001>
module attributes {stable_mosaic.version = 11 : i64} {
  func.func @kernel(%arg0: i32, %arg1: memref<8x8xf32, #tpu.memory_space<vmem>>, %arg2: memref<8x128xf32, #tpu.memory_space<vmem>>, %arg3: memref<1x128xf32, #tpu.memory_space<vmem>>, %arg4: memref<128x128xf32, #tpu.memory_space<vmem>>, %arg5: memref<1x128xf32, #tpu.memory_space<vmem>>, %arg6: memref<128x128xf32, #tpu.memory_space<vmem>>, %arg7: memref<1x128xf32, #tpu.memory_space<vmem>>, %arg8: memref<8x4xf32, #tpu.memory_space<vmem>>, %arg9: memref<8x1xi32, #tpu.memory_space<vmem>>) attributes {dimension_semantics = [#tpu.dimension_semantics<parallel>], iteration_bounds = array<i64: 1>, scalar_prefetch = 0 : i64, scratch_operands = 0 : i64, tpu.core_type = #tpu.core_type<tc>, window_params = [{transform_indices = @transform_0, window_bounds = array<i64: 8, 8>}, {pipeline_mode = #tpu.pipeline_mode<synchronous>, transform_indices = @transform_1, window_bounds = array<i64: 8, 128>}, {pipeline_mode = #tpu.pipeline_mode<synchronous>, transform_indices = @transform_2, window_bounds = array<i64: 1, 128>}, {pipeline_mode = #tpu.pipeline_mode<synchronous>, transform_indices = @transform_3, window_bounds = array<i64: 128, 128>}, {pipeline_mode = #tpu.pipeline_mode<synchronous>, transform_indices = @transform_4, window_bounds = array<i64: 1, 128>}, {pipeline_mode = #tpu.pipeline_mode<synchronous>, transform_indices = @transform_5, window_bounds = array<i64: 128, 128>}, {pipeline_mode = #tpu.pipeline_mode<synchronous>, transform_indices = @transform_6, window_bounds = array<i64: 1, 128>}, {transform_indices = @transform_7, window_bounds = array<i64: 8, 4>}, {transform_indices = @transform_8, window_bounds = array<i64: 8, 1>}]} {
    %c0 = arith.constant 0 : index
    %c0_0 = arith.constant 0 : index
    %0 = vector.load %arg1[%c0, %c0_0] : memref<8x8xf32, #tpu.memory_space<vmem>>, vector<8x8xf32>
    %c0_1 = arith.constant 0 : index
    %c0_2 = arith.constant 0 : index
    %1 = vector.load %arg2[%c0_1, %c0_2] : memref<8x128xf32, #tpu.memory_space<vmem>>, vector<8x128xf32>
    %c0_3 = arith.constant 0 : index
    %c0_4 = arith.constant 0 : index
    %2 = vector.load %arg3[%c0_3, %c0_4] : memref<1x128xf32, #tpu.memory_space<vmem>>, vector<1x128xf32>
    %cst = arith.constant dense<0.000000e+00> : vector<8x128xf32>
    %3 = tpu.matmul %0, %1, %cst {dimension_numbers = #tpu.dot_dimension_numbers<[1], [0], [0], [1], [0, 0, 1, 1], [], []>} : vector<8x8xf32>, vector<8x128xf32>, vector<8x128xf32> -> vector<8x128xf32>
    %4 = vector.broadcast %2 : vector<1x128xf32> to vector<8x128xf32>
    %5 = arith.addf %3, %4 : vector<8x128xf32>
    %cst_5 = arith.constant 0.000000e+00 : f32
    %6 = vector.broadcast %cst_5 : f32 to vector<8x128xf32>
    %7 = arith.maximumf %5, %6 : vector<8x128xf32>
    %c0_6 = arith.constant 0 : index
    %c0_7 = arith.constant 0 : index
    %8 = vector.load %arg4[%c0_6, %c0_7] : memref<128x128xf32, #tpu.memory_space<vmem>>, vector<128x128xf32>
    %c0_8 = arith.constant 0 : index
    %c0_9 = arith.constant 0 : index
    %9 = vector.load %arg5[%c0_8, %c0_9] : memref<1x128xf32, #tpu.memory_space<vmem>>, vector<1x128xf32>
    %cst_10 = arith.constant dense<0.000000e+00> : vector<8x128xf32>
    %10 = tpu.matmul %7, %8, %cst_10 {dimension_numbers = #tpu.dot_dimension_numbers<[1], [0], [0], [1], [0, 0, 1, 1], [], []>} : vector<8x128xf32>, vector<128x128xf32>, vector<8x128xf32> -> vector<8x128xf32>
    %11 = vector.broadcast %9 : vector<1x128xf32> to vector<8x128xf32>
    %12 = arith.addf %10, %11 : vector<8x128xf32>
    %cst_11 = arith.constant 0.000000e+00 : f32
    %13 = vector.broadcast %cst_11 : f32 to vector<8x128xf32>
    %14 = arith.maximumf %12, %13 : vector<8x128xf32>
    %c0_12 = arith.constant 0 : index
    %c0_13 = arith.constant 0 : index
    %15 = vector.load %arg6[%c0_12, %c0_13] : memref<128x128xf32, #tpu.memory_space<vmem>>, vector<128x128xf32>
    %c0_14 = arith.constant 0 : index
    %c0_15 = arith.constant 0 : index
    %16 = vector.load %arg7[%c0_14, %c0_15] : memref<1x128xf32, #tpu.memory_space<vmem>>, vector<1x128xf32>
    %cst_16 = arith.constant dense<0.000000e+00> : vector<8x128xf32>
    %17 = tpu.matmul %14, %15, %cst_16 {dimension_numbers = #tpu.dot_dimension_numbers<[1], [0], [0], [1], [0, 0, 1, 1], [], []>} : vector<8x128xf32>, vector<128x128xf32>, vector<8x128xf32> -> vector<8x128xf32>
    %18 = vector.broadcast %16 : vector<1x128xf32> to vector<8x128xf32>
    %19 = arith.addf %17, %18 : vector<8x128xf32>
    %20 = tpu.iota {dimensions = array<i32: 1>} : vector<8x128xi32>
    %c4_i32 = arith.constant 4 : i32
    %21 = vector.broadcast %c4_i32 : i32 to vector<8x128xi32>
    %22 = arith.cmpi slt, %20, %21 : vector<8x128xi32>
    %cst_17 = arith.constant 0xFF800000 : f32
    %23 = vector.broadcast %cst_17 : f32 to vector<8x128xf32>
    %24 = arith.select %22, %19, %23 : vector<8x128xi1>, vector<8x128xf32>
    %cst_18 = arith.constant dense<0xFF800000> : vector<8xf32>
    %25 = vector.multi_reduction <maximumf>, %24, %cst_18 [1] : vector<8x128xf32> to vector<8xf32>
    %26 = vector.shape_cast %25 : vector<8xf32> to vector<8x1xf32>
    %27 = vector.broadcast %26 : vector<8x1xf32> to vector<8x128xf32>
    %28 = arith.cmpf oeq, %24, %27 : vector<8x128xf32>
    %29 = arith.andi %22, %28 : vector<8x128xi1>
    %c128_i32 = arith.constant 128 : i32
    %30 = vector.broadcast %c128_i32 : i32 to vector<8x128xi32>
    %31 = arith.select %29, %20, %30 : vector<8x128xi1>, vector<8x128xi32>
    %cst_19 = arith.constant dense<2147483647> : vector<8xi32>
    %32 = vector.multi_reduction <minsi>, %31, %cst_19 [1] : vector<8x128xi32> to vector<8xi32>
    %33 = vector.shape_cast %32 : vector<8xi32> to vector<8x1xi32>
    %c0_20 = arith.constant 0 : index
    %c0_21 = arith.constant 0 : index
    %34 = vector.load %arg9[%c0_20, %c0_21] : memref<8x1xi32, #tpu.memory_space<vmem>>, vector<8x1xi32>
    tpu.vector_store %arg9[%c0_20, %c0_21], %33 {strides = array<i32>} : memref<8x1xi32, #tpu.memory_space<vmem>>, vector<8x1xi32>,
    %35 = vector.extract_strided_slice %19 {offsets = [0, 0], sizes = [8, 4], strides = [1, 1]} : vector<8x128xf32> to vector<8x4xf32>
    %c0_22 = arith.constant 0 : index
    %c0_23 = arith.constant 0 : index
    %36 = vector.load %arg8[%c0_22, %c0_23] : memref<8x4xf32, #tpu.memory_space<vmem>>, vector<8x4xf32>
    tpu.vector_store %arg8[%c0_22, %c0_23], %35 {strides = array<i32>} : memref<8x4xf32, #tpu.memory_space<vmem>>, vector<8x4xf32>,
    return
  }
  func.func @transform_0(%arg0: i32) -> (i32, i32) {
    %c0_i32 = arith.constant 0 : i32
    %c0_i32_0 = arith.constant 0 : i32
    return %arg0, %c0_i32 : i32, i32
  }
  func.func @transform_1(%arg0: i32) -> (i32, i32) {
    %c0_i32 = arith.constant 0 : i32
    %c0_i32_0 = arith.constant 0 : i32
    %c0_i32_1 = arith.constant 0 : i32
    return %c0_i32, %c0_i32_0 : i32, i32
  }
  func.func @transform_2(%arg0: i32) -> (i32, i32) {
    %c0_i32 = arith.constant 0 : i32
    %c0_i32_0 = arith.constant 0 : i32
    %c0_i32_1 = arith.constant 0 : i32
    return %c0_i32, %c0_i32_0 : i32, i32
  }
  func.func @transform_3(%arg0: i32) -> (i32, i32) {
    %c0_i32 = arith.constant 0 : i32
    %c0_i32_0 = arith.constant 0 : i32
    %c0_i32_1 = arith.constant 0 : i32
    return %c0_i32, %c0_i32_0 : i32, i32
  }
  func.func @transform_4(%arg0: i32) -> (i32, i32) {
    %c0_i32 = arith.constant 0 : i32
    %c0_i32_0 = arith.constant 0 : i32
    %c0_i32_1 = arith.constant 0 : i32
    return %c0_i32, %c0_i32_0 : i32, i32
  }
  func.func @transform_5(%arg0: i32) -> (i32, i32) {
    %c0_i32 = arith.constant 0 : i32
    %c0_i32_0 = arith.constant 0 : i32
    %c0_i32_1 = arith.constant 0 : i32
    return %c0_i32, %c0_i32_0 : i32, i32
  }
  func.func @transform_6(%arg0: i32) -> (i32, i32) {
    %c0_i32 = arith.constant 0 : i32
    %c0_i32_0 = arith.constant 0 : i32
    %c0_i32_1 = arith.constant 0 : i32
    return %c0_i32, %c0_i32_0 : i32, i32
  }
  func.func @transform_7(%arg0: i32) -> (i32, i32) {
    %c0_i32 = arith.constant 0 : i32
    %c0_i32_0 = arith.constant 0 : i32
    return %arg0, %c0_i32 : i32, i32
  }
  func.func @transform_8(%arg0: i32) -> (i32, i32) {
    %c0_i32 = arith.constant 0 : i32
    %c0_i32_0 = arith.constant 0 : i32
    return %arg0, %c0_i32 : i32, i32
  }
}

</mosaic_0001>

<bundles_post_ra>
// kernel: tpu_custom_call.1
= control target key start
LH: loop header
LB: loop body
LE: loop exit
PB: predicated region body
PF: predicated region fallthrough
CT: control target
= control target key end

     0   :  { %14 = vsyncpa [#allocation3], 0  ;;  %s716_s0 = inlined_call_operand.hbm [shape: f32[8,8], index: 0, kind: input, shape index: {}]   ;;  %s717_s1 = inlined_call_operand.hbm [shape: f32[8,128], index: 1, kind: input, shape index: {}]   ;;  %s718_s2 = inlined_call_operand.vmem [shape: f32[1,128], index: 2, kind: input, shape index: {}]   ;;  %s719_s3 = inlined_call_operand.hbm [shape: f32[128,128], index: 3, kind: input, shape index: {}]   ;;  %s720_s4 = inlined_call_operand.vmem [shape: f32[1,128], index: 4, kind: input, shape index: {}]   ;;  %s721_s5 = inlined_call_operand.hbm [shape: f32[128,128], index: 5, kind: input, shape index: {}]   ;;  %s722_s6 = inlined_call_operand.vmem [shape: f32[1,128], index: 6, kind: input, shape index: {}]   ;;  %s723_s7 = inlined_call_operand.vmem [shape: f32[8,4], index: 7, kind: output, shape index: {0}]   ;;  %s724_s8 = inlined_call_operand.vmem [shape: s32[8,1], index: 8, kind: output, shape index: {1}]  }
   0x1   :  { %15 = vsyncpa [#allocation5], 0 }
   0x2   :  { %16 = vsyncpa [#allocation8], 0  ;;  %s597_s27 = smov [#allocation4]   ;;  %s598_s29 = smov [#allocation2]  }
   0x3   :  { %s33_s28 = sshll.u32 %s597_s27, 4  ;;  %s23_s30 = sshll.u32 %s598_s29, 4  ;;  %s34_s28 = int_to_ptr.vmem [resolvable:$true] %s33_s28  ;;  %s24_s30 = int_to_ptr.vmem [resolvable:$true] %s23_s30 }
   0x4   :  { %s519_s9 = scalar_lea.vmem %s34_s28, 128  ;;  %p524_p1 = scmp.lt.s32.totalorder %s34_s28, %s34_s28 }
   0x5   :  { %p520_p0 = scmp.ne.s32.totalorder %s34_s28, %s519_s9  ;;  %p525_p2 = scmp.lt.s32.totalorder %s519_s9, %s519_s9 }
   0x7   :  { %p526_p3 = por %p525_p2, %p524_p1 }
   0x9   :  { %p527_p4 = pnand %p526_p3, %p520_p0 }
   0xb   :  { %530 = shalt.err (!%p527_p4)
}
   0xc   :  { %36 = dma.hbm_to_vmem [thread:$0]  %s717_s1, 128, %s34_s28, [#allocation5]  }
   0xd   :  { %s539_s12 = scalar_lea.vmem %s24_s30, 128  ;;  %p544_p6 = scmp.lt.s32.totalorder %s24_s30, %s24_s30 }
   0xe   :  { %p540_p5 = scmp.ne.s32.totalorder %s24_s30, %s539_s12  ;;  %p545_p7 = scmp.lt.s32.totalorder %s539_s12, %s539_s12 }
  0x10   :  { %p546_p8 = por %p545_p7, %p544_p6 }
  0x12   :  { %p547_p9 = pnand %p546_p8, %p540_p5 }
  0x14   :  { %550 = shalt.err (!%p547_p9)
}
  0x15   :  { %26 = dma.hbm_to_vmem [thread:$0]  %s716_s0, 128, %s24_s30, [#allocation3]  }
  0x16   :  { %s599_s15 = smov [#allocation6]  }
  0x17   :  { %s44_s16 = sshll.u32 %s599_s15, 4  ;;  %s45_s16 = int_to_ptr.vmem [resolvable:$true] %s44_s16 }
  0x18   :  { %s559_s17 = scalar_lea.vmem %s45_s16, 2048  ;;  %p564_p11 = scmp.lt.s32.totalorder %s45_s16, %s45_s16 }
  0x19   :  { %p560_p10 = scmp.ne.s32.totalorder %s45_s16, %s559_s17  ;;  %p565_p12 = scmp.lt.s32.totalorder %s559_s17, %s559_s17 }
  0x1b   :  { %p566_p13 = por %p565_p12, %p564_p11 }
  0x1d   :  { %p567_p0 = pnand %p566_p13, %p560_p10 }
  0x1f   :  { %570 = shalt.err (!%p567_p0)
}
  0x20   :  { %s600_s1 = smov 128   ;;  %s601_s18 = smov 8  }
  0x21   :  { %50 = dma.hbm_to_vmem [thread:$0]  %s719_s3, 2048, %s45_s16, [#allocation5], %s600_s1, %s600_s1, %s601_s18  }
  0x22   :  { %s602_s21 = smov [#allocation7]  }
  0x23   :  { %s58_s22 = sshll.u32 %s602_s21, 4  ;;  %s59_s22 = int_to_ptr.vmem [resolvable:$true] %s58_s22 }
  0x24   :  { %s579_s0 = scalar_lea.vmem %s59_s22, 2048  ;;  %p584_p2 = scmp.lt.s32.totalorder %s59_s22, %s59_s22 }
  0x25   :  { %p580_p1 = scmp.ne.s32.totalorder %s59_s22, %s579_s0  ;;  %p585_p3 = scmp.lt.s32.totalorder %s579_s0, %s579_s0 }
  0x27   :  { %p586_p4 = por %p585_p3, %p584_p2 }
  0x29   :  { %p587_p5 = pnand %p586_p4, %p580_p1 }
  0x2b   :  { %590 = shalt.err (!%p587_p5)
}
  0x2c   :  { %64 = dma.hbm_to_vmem [thread:$0]  %s721_s5, 2048, %s59_s22, [#allocation8], %s600_s1, %s600_s1, %s601_s18  }
  0x2d   :  { %591 = dma.done.wait [#allocation3], 128  }
  0x2e   :  { %592 = vsyncadd [#allocation3], 4294967168 }
  0x2f   :  { %593 = dma.done.wait [#allocation5], 2176  }
  0x30   :  { %594 = vsyncadd [#allocation5], 4294965120 }
  0x31   :  { %595 = dma.done.wait [#allocation8], 2048  }
  0x32   :  { %596 = vsyncadd [#allocation8], 4294965248  ;;  %v603_v0 = vmov 0.0   ;;  %vm604_vm0 = vmmov 0   ;;  %vm88_vm1 = vcmask 64512   ;;  %v80_v1 = vld [vmem:[#allocation4] sm:$0xff]  ;;  %v350_v45 = vlaneseq }
  0x33   :  { %428 = vmatprep.subr.mxu0 %v603_v0  ;;  %430 = vmatprep.mubr.msk.f32.mxu0 %vm604_vm0, %v603_v0  ;;  %v79_v2 = vld [vmem:[#allocation2] sm:$0xff]  ;;  %v178_v3 = vld [vmem:[#allocation6 + $0x78] sm:$0xff]  ;;  %v176_v5 = vld [vmem:[#allocation6 + $0x68] sm:$0xff]  ;;  %vm375_vm2 = vcmask 31744   ;;  %vm373_vm7 = vcmask 7168  }
  0x34   :  { %433 = vmatprep.subr.mxu1 %v603_v0  ;;  %465 = vmatprep.mubr.msk.f32.mxu1 %vm604_vm0, %v603_v0  ;;  %v177_v4 = vld [vmem:[#allocation6 + $0x70] sm:$0xff]  ;;  %v175_v6 = vld [vmem:[#allocation6 + $0x60] sm:$0xff]  ;;  %v174_v7 = vld [vmem:[#allocation6 + $0x58] sm:$0xff]  ;;  %v351_v46 = vand.u32 127, %v350_v45 }
  0x35   :  { %429 = vmatpush3.msra.mxu0 %v80_v1  ;;  %434 = vmatpush3.msra.mxu1 %v178_v3  ;;  %v173_v8 = vld [vmem:[#allocation6 + $0x50] sm:$0xff]  ;;  %v172_v9 = vld [vmem:[#allocation6 + $0x48] sm:$0xff]  ;;  %v171_v10 = vld [vmem:[#allocation6 + $0x40] sm:$0xff] }
  0x36   :  { %431 = vmatmul.mubr.msk.f32.vlgmr.msra.gmra.mxu0 %vm88_vm1, %v79_v2  ;;  %435 = vmatprep.subr.mxu1 %v603_v0  ;;  %v170_v11 = vld [vmem:[#allocation6 + $0x38] sm:$0xff]  ;;  %v169_v12 = vld [vmem:[#allocation6 + $0x30] sm:$0xff]  ;;  %v168_v13 = vld [vmem:[#allocation6 + $0x28] sm:$0xff]  ;;  %vm352_vm3 = vcmp.lt.s32.totalorder %v351_v46, 4 }
  0x37   :  { %436 = vmatpush3.msra.mxu1 %v177_v4  ;;  %468 = vmatprep.subr.mxu0 %v603_v0  ;;  %v167_v14 = vld [vmem:[#allocation6 + $0x20] sm:$0xff]  ;;  %v166_v15 = vld [vmem:[#allocation6 + $0x18] sm:$0xff]  ;;  %v165_v16 = vld [vmem:[#allocation6 + $0x10] sm:$0xff] }
  0x38   :  { %437 = vmatprep.subr.mxu1 %v603_v0  ;;  %500 = vmatprep.mubr.msk.f32.mxu0 %vm604_vm0, %v603_v0  ;;  %v164_v17 = vld [vmem:[#allocation6 + $0x8] sm:$0xff]  ;;  %v163_v18 = vld [vmem:[#allocation6] sm:$0xff]  ;;  %v272_v19 = vld [vmem:[#allocation7 + $0x78] sm:$0xff] }
  0x39   :  { %438 = vmatpush3.msra.mxu1 %v176_v5  ;;  %v271_v20 = vld [vmem:[#allocation7 + $0x70] sm:$0xff]  ;;  %469 = vmatpush3.msra.mxu0 %v272_v19  ;;  %v270_v21 = vld [vmem:[#allocation7 + $0x68] sm:$0xff]  ;;  %v269_v22 = vld [vmem:[#allocation7 + $0x60] sm:$0xff] }
  0x3a   :  { %439 = vmatprep.subr.mxu1 %v603_v0  ;;  %470 = vmatprep.subr.mxu0 %v603_v0  ;;  %v268_v23 = vld [vmem:[#allocation7 + $0x58] sm:$0xff]  ;;  %v267_v24 = vld [vmem:[#allocation7 + $0x50] sm:$0xff]  ;;  %v266_v25 = vld [vmem:[#allocation7 + $0x48] sm:$0xff] }
  0x3b   :  { %440 = vmatpush3.msra.mxu1 %v175_v6  ;;  %471 = vmatpush3.msra.mxu0 %v271_v20  ;;  %v265_v26 = vld [vmem:[#allocation7 + $0x40] sm:$0xff]  ;;  %v264_v27 = vld [vmem:[#allocation7 + $0x38] sm:$0xff]  ;;  %v263_v28 = vld [vmem:[#allocation7 + $0x30] sm:$0xff] }
  0x3c   :  { %441 = vmatprep.subr.mxu1 %v603_v0  ;;  %472 = vmatprep.subr.mxu0 %v603_v0  ;;  %v262_v29 = vld [vmem:[#allocation7 + $0x28] sm:$0xff]  ;;  %v261_v30 = vld [vmem:[#allocation7 + $0x20] sm:$0xff]  ;;  %v260_v31 = vld [vmem:[#allocation7 + $0x18] sm:$0xff] }
  0x3d   :  { %442 = vmatpush3.msra.mxu1 %v174_v7  ;;  %473 = vmatpush3.msra.mxu0 %v270_v21  ;;  %v388_v32 = vld [vmem:[%s718_s2] ss:$0 sm:$0xff]  ;;  %v258_v38 = vld [vmem:[#allocation7 + $0x8] sm:$0xff]  ;;  %v257_v39 = vld [vmem:[#allocation7] sm:$0xff] }
  0x3e   :  { %443 = vmatprep.subr.mxu1 %v603_v0  ;;  %474 = vmatprep.subr.mxu0 %v603_v0  ;;  %v259_v37 = vld [vmem:[#allocation7 + $0x10] sm:$0xff] }
  0x3f   :  { %444 = vmatpush3.msra.mxu1 %v173_v8  ;;  %475 = vmatpush3.msra.mxu0 %v269_v22  ;;  %v390_v40 = vld [vmem:[%s720_s4] ss:$0 sm:$0xff] }
  0x40   :  { %445 = vmatprep.subr.mxu1 %v603_v0  ;;  %476 = vmatprep.subr.mxu0 %v603_v0  ;;  %v391_v47 = vld [vmem:[%s722_s6] ss:$0 sm:$0xff] }
  0x41   :  { %446 = vmatpush3.msra.mxu1 %v172_v9  ;;  %477 = vmatpush3.msra.mxu0 %v268_v23 }
  0x42   :  { %447 = vmatprep.subr.mxu1 %v603_v0  ;;  %478 = vmatprep.subr.mxu0 %v603_v0 }
  0x43   :  { %448 = vmatpush3.msra.mxu1 %v171_v10  ;;  %479 = vmatpush3.msra.mxu0 %v267_v24 }
  0x44   :  { %449 = vmatprep.subr.mxu1 %v603_v0  ;;  %480 = vmatprep.subr.mxu0 %v603_v0 }
  0x45   :  { %450 = vmatpush3.msra.mxu1 %v170_v11  ;;  %481 = vmatpush3.msra.mxu0 %v266_v25 }
  0x46   :  { %451 = vmatprep.subr.mxu1 %v603_v0  ;;  %482 = vmatprep.subr.mxu0 %v603_v0 }
  0x47   :  { %452 = vmatpush3.msra.mxu1 %v169_v12  ;;  %483 = vmatpush3.msra.mxu0 %v265_v26 }
  0x48   :  { %453 = vmatprep.subr.mxu1 %v603_v0  ;;  %484 = vmatprep.subr.mxu0 %v603_v0 }
  0x49   :  { %454 = vmatpush3.msra.mxu1 %v168_v13  ;;  %485 = vmatpush3.msra.mxu0 %v264_v27 }
  0x4a   :  { %455 = vmatprep.subr.mxu1 %v603_v0  ;;  %486 = vmatprep.subr.mxu0 %v603_v0 }
  0x4b   :  { %456 = vmatpush3.msra.mxu1 %v167_v14  ;;  %487 = vmatpush3.msra.mxu0 %v263_v28 }
  0x4c   :  { %457 = vmatprep.subr.mxu1 %v603_v0  ;;  %488 = vmatprep.subr.mxu0 %v603_v0 }
  0x4d   :  { %458 = vmatpush3.msra.mxu1 %v166_v15  ;;  %489 = vmatpush3.msra.mxu0 %v262_v29 }
  0x4e   :  { %459 = vmatprep.subr.mxu1 %v603_v0  ;;  %490 = vmatprep.subr.mxu0 %v603_v0 }
  0x4f   :  { %460 = vmatpush3.msra.mxu1 %v165_v16  ;;  %491 = vmatpush3.msra.mxu0 %v261_v30 }
  0x50   :  { %461 = vmatprep.subr.mxu1 %v603_v0  ;;  %492 = vmatprep.subr.mxu0 %v603_v0 }
  0x51   :  { %462 = vmatpush3.msra.mxu1 %v164_v17  ;;  %493 = vmatpush3.msra.mxu0 %v260_v31 }
  0x52   :  { %463 = vmatprep.subr.mxu1 %v603_v0  ;;  %494 = vmatprep.subr.mxu0 %v603_v0 }
  0x53   :  { %464 = vmatpush3.msra.mxu1 %v163_v18  ;;  %495 = vmatpush3.msra.mxu0 %v259_v37 }
  0x54   :  { %496 = vmatprep.subr.mxu0 %v603_v0 }
  0x55   :  { %497 = vmatpush3.msra.mxu0 %v258_v38 }
  0x56   :  { %498 = vmatprep.subr.mxu0 %v603_v0 }
  0x57   :  { %499 = vmatpush3.msra.mxu0 %v257_v39 }
  0xf6   :  { %v158_v33 = vpop.f32.mrf.mxu0 }
  0xf7   :  { %v159_v34 = vadd.f32 %v388_v32, %v158_v33 }
  0xf8   :  { %v432_v35 = vpop.f32.mrf.mxu0 }
  0xf9   :  { %v162_v36 = vmax.f32 %v159_v34, 0.0 }
  0xfb   :  { %466 = vmatmul.mubr.f32.vlgmr.msra.gmra.mxu1 %v162_v36 }
 0x1bb   :  { %v252_v41 = vpop.f32.mrf.mxu1 }
 0x1bc   :  { %v253_v42 = vadd.f32 %v390_v40, %v252_v41 }
 0x1bd   :  { %v467_v43 = vpop.f32.mrf.mxu1 }
 0x1be   :  { %v256_v44 = vmax.f32 %v253_v42, 0.0 }
 0x1c0   :  { %501 = vmatmul.mubr.f32.vlgmr.msra.gmra.mxu0 %v256_v44 }
 0x280   :  { %v346_v48 = vpop.f32.mrf.mxu0 }
 0x281   :  { %v347_v49 = vadd.f32 %v391_v47, %v346_v48 }
 0x282   :  { %v502_v50 = vpop.f32.mrf.mxu0 }
 0x283   :  { %376 = vst.msk [vmem:[%s723_s7] sm:$0xff] %vm375_vm2, %v347_v49  ;;  %v353_v51 = vsel %vm352_vm3, %v347_v49, -inf }
 0x284   :  { %354 = vmax.xlane.f32.xlu0 %v353_v51 }
 0x30d   :  { %v355_v52 = vpop.xlane.xlu0 %354 }
 0x30e   :  { %vm356_vm4 = vcmp.eq.f32.partialorder %v353_v51, %v355_v52 }
 0x30f   :  { %vm357_vm5 = vmand %vm352_vm3, %vm356_vm4 }
 0x310   :  { %v358_v53 = vsel %vm357_vm5, %v351_v46, 128 }
 0x311   :  { %v360_v54 = vshra.s32 %v358_v53, 16  ;;  %v359_v56 = vand.u32 65535, %v358_v53 }
 0x313   :  { %v362_v55 = vcvt.s32.f32 %v360_v54  ;;  %v361_v58 = vcvt.s32.f32 %v359_v56 }
 0x315   :  { %363 = vmin.xlane.f32.xlu0 %v362_v55 }
 0x39e   :  { %v364_v57 = vpop.xlane.xlu0 %363 }
 0x39f   :  { %vm365_vm6 = vcmp.eq.f32.partialorder %v362_v55, %v364_v57  ;;  %v370_v60 = vcvt.f32.s32 %v364_v57 }
 0x3a0   :  { %v366_v59 = vsel %vm365_vm6, %v361_v58, inf }
 0x3a1   :  { %367 = vmin.xlane.f32.xlu1 %v366_v59  ;;  %v371_v62 = vshll.u32 %v370_v60, 16 }
 0x42a   :  { %v368_v61 = vpop.xlane.xlu1 %367 }
 0x42b   :  { %v369_v63 = vcvt.f32.s32 %v368_v61 }
 0x42d   :  { %v372_v0 = vadd.s32 %v371_v62, %v369_v63 }
 0x42f   :  { %374 = vst.msk [vmem:[%s724_s8] sm:$0xff] %vm373_vm7, %v372_v0 }
 0x430   :  { %385 = vsyncpa [#allocation3], 1 }
 0x431   :  { %386 = vsyncpa [#allocation5], 1 }
 0x432   :  { %387 = vsyncpa [#allocation8], 1 }

</bundles_post_ra>
